<compile_context>
chip_gen: v6e
topology: v6e:2x2x1
jax: 0.10.0
libtpu: 0.0.40
codegen_flags: <defaults>
</compile_context>

<pallas_src>
import functools
import math

import jax
import jax.numpy as jnp
from jax.experimental import pallas as pl
from jax.experimental.pallas import tpu as pltpu

_LANE = 128     # lane width: last dim of every VMEM block
_SUBLANE = 8    # sublane granularity for the second-to-last dim


def _round_up(n, m):
    return ((n + m - 1) // m) * m


def _pad2d(a, rows, cols):
    pr, pc = rows - a.shape[0], cols - a.shape[1]
    if pr or pc:
        a = jnp.pad(a, ((0, pr), (0, pc)))
    return a


@functools.lru_cache(maxsize=1)
def _vmem_capacity_bytes():
    # Narrow fallback only around the hardware query; default to the most
    # constrained generation (v7x: 64 MiB per TensorCore) if unavailable.
    try:
        return int(pltpu.get_tpu_info().vmem_capacity_bytes)
    except Exception:   # hardware-info query compatibility only
        return 64 << 20


# ------------------------------- kernels -----------------------------------


def _mlp_fused_kernel(x_ref, w1_ref, b1_ref, w2_ref, b2_ref, o_ref):
    """Both layers in one grid step; weights fully VMEM resident."""
    # In-kernel VPU cast to bf16 (hides under MXU/DMA slack; keeps x's HBM
    # traffic at its native width).  f32 accumulation; f32 tanh on the EUP.
    x = x_ref[...].astype(jnp.bfloat16)
    h = jnp.tanh(
        jnp.dot(x, w1_ref[...], preferred_element_type=jnp.float32) + b1_ref[...]
    )
    o = jnp.tanh(
        jnp.dot(h.astype(jnp.bfloat16), w2_ref[...],
                preferred_element_type=jnp.float32) + b2_ref[...]
    )
    o_ref[...] = o.astype(o_ref.dtype)


def _mlp_htiled_kernel(x_ref, w1_ref, b1_ref, w2_ref, b2_ref, o_ref, acc_ref):
    """Hidden dim streamed in chunks; f32 accumulator held in VMEM scratch."""
    k = pl.program_id(1)

    @pl.when(k == 0)
    def _():
        acc_ref[...] = jnp.zeros_like(acc_ref)

    x = x_ref[...].astype(jnp.bfloat16)
    # Layer 1 for this hidden chunk only (tanh is per-hidden-unit, so chunking
    # the hidden dim is exact), then fold straight into layer 2's accumulator
    # without ever materializing the full (batch_tile, H) hidden.
    h = jnp.tanh(
        jnp.dot(x, w1_ref[...], preferred_element_type=jnp.float32) + b1_ref[...]
    )
    acc_ref[...] += jnp.dot(h.astype(jnp.bfloat16), w2_ref[...],
                            preferred_element_type=jnp.float32)

    @pl.when(k == pl.num_programs(1) - 1)
    def _():
        o_ref[...] = jnp.tanh(acc_ref[...] + b2_ref[...]).astype(o_ref.dtype)


# ------------------------------ wrappers ------------------------------------


def prepare_mlp_params(w1, b1, w2, b2):
    """Pad feature axes to lane multiples (128) and cast weights to bf16 ONCE."""
    d_in, h = w1.shape
    d_out = w2.shape[1]
    d_in_p = _round_up(d_in, _LANE)
    h_p = _round_up(h, _LANE)
    d_out_p = _round_up(d_out, _LANE)
    w1_p = _pad2d(jnp.asarray(w1), d_in_p, h_p).astype(jnp.bfloat16)
    w2_p = _pad2d(jnp.asarray(w2), h_p, d_out_p).astype(jnp.bfloat16)
    b1_p = _pad2d(jnp.asarray(b1, dtype=jnp.float32).reshape(1, h), 1, h_p)
    b2_p = _pad2d(jnp.asarray(b2, dtype=jnp.float32).reshape(1, d_out), 1, d_out_p)
    return w1_p, b1_p, w2_p, b2_p


def _default_batch_tile(batch, vmem_cap):
    # 512-row tiles on 128 MiB chips (v5e/v6e); 256 on v7x (64 MiB, 2 TCs).
    target = 512 if vmem_cap > (96 << 20) else 256
    if batch <= 2 * target:
        # Guarantee >= 2 grid steps when the batch allows, so the "parallel"
        # batch axis can actually be split across v7x's two TensorCores.
        tile = min(target, _round_up(max(batch // 2, 1), _SUBLANE))
    else:
        tile = target
    return max(tile, _SUBLANE)


def _pick_h_tile(h_p, d_in_p, d_out_p, batch_tile, vmem_cap):
    # v6e/v7x MXUs are 2x256x256: prefer 256-multiples for the hidden (K)
    # chunk; 128 is the fallback (and is fine on v5e's 4x128x128 MXU).
    budget = int(0.6 * vmem_cap)
    for cand in (512, 256, 128):
        if h_p % cand:
            continue
        chunk_w = (d_in_p * cand + cand * d_out_p) * 2 + (cand + d_out_p) * 4
        live = (2 * batch_tile * (d_in_p + d_out_p) * 4   # dbl-buffered x/out
                + 2 * chunk_w                             # dbl-buffered chunk
                + batch_tile * d_out_p * 4                # f32 accumulator
                + batch_tile * cand * 4)                  # f32 hidden chunk
        if live <= budget:
            return cand
    return 128


@functools.partial(jax.jit,
                   static_argnames=("d_out", "batch_tile", "force_h_tiled"))
def mlp_forward_padded(x, w1_p, b1_p, w2_p, b2_p, *, d_out,
                       batch_tile=None, force_h_tiled=False):
    """MLP forward on pre-padded params: tanh(tanh(x @ W1 + b1) @ W2 + b2)."""
    B, d_in = x.shape
    d_in_p, h_p = w1_p.shape
    d_out_p = w2_p.shape[1]
    assert d_in <= d_in_p and d_out <= d_out_p
    out_dtype = x.dtype
    x_item = jnp.dtype(x.dtype).itemsize
    out_item = jnp.dtype(out_dtype).itemsize

    vmem_cap = _vmem_capacity_bytes()
    if batch_tile is None:
        batch_tile = _default_batch_tile(B, vmem_cap)
    assert batch_tile % _SUBLANE == 0, "batch_tile must be a multiple of 8"
    B_p = _round_up(B, batch_tile)
    grid_b = B_p // batch_tile

    # Batch / lane zero-padding only (fused under jit; no-op when aligned).
    # x keeps its HBM dtype: the bf16 cast happens inside the kernel.
    x_p = _pad2d(x, B_p, d_in_p)

    cost = pl.CostEstimate(
        flops=2 * B_p * (d_in_p * h_p + h_p * d_out_p),
        transcendentals=B_p * (h_p + d_out_p),
        bytes_accessed=(B_p * d_in_p * x_item
                        + (d_in_p * h_p + h_p * d_out_p) * 2
                        + (h_p + d_out_p) * 4
                        + B_p * d_out_p * out_item),
    )

    bytes_x_tile = batch_tile * d_in_p * x_item
    bytes_o_tile = batch_tile * d_out_p * out_item
    bytes_w_full = (d_in_p * h_p + h_p * d_out_p) * 2 + (h_p + d_out_p) * 4
    fused_fp = (2 * (bytes_x_tile + bytes_o_tile)   # double-buffered x/out
                + 2 * bytes_w_full                  # weight buffers
                + batch_tile * h_p * 4)             # live f32 hidden
    use_fused = (not force_h_tiled) and fused_fp <= int(0.6 * vmem_cap)

    if use_fused:
        vmem_limit = int(min(max(2 * fused_fp + (4 << 20), 32 << 20),
                             int(0.9 * vmem_cap)))
        out = pl.pallas_call(
            _mlp_fused_kernel,
            out_shape=jax.ShapeDtypeStruct((B_p, d_out_p), out_dtype),
            grid_spec=pltpu.PrefetchScalarGridSpec(
                num_scalar_prefetch=0,
                grid=(grid_b,),
                in_specs=[
                    pl.BlockSpec((batch_tile, d_in_p), lambda i: (i, 0)),  # x
                    pl.BlockSpec((d_in_p, h_p), lambda i: (0, 0)),         # W1
                    pl.BlockSpec((1, h_p), lambda i: (0, 0)),              # b1
                    pl.BlockSpec((h_p, d_out_p), lambda i: (0, 0)),        # W2
                    pl.BlockSpec((1, d_out_p), lambda i: (0, 0)),          # b2
                ],
                out_specs=pl.BlockSpec((batch_tile, d_out_p),
                                       lambda i: (i, 0)),
            ),
            compiler_params=pltpu.CompilerParams(
                dimension_semantics=("parallel",),
                vmem_limit_bytes=vmem_limit,
            ),
            cost_estimate=cost,
        )(x_p, w1_p, b1_p, w2_p, b2_p)
    else:
        h_tile = _pick_h_tile(h_p, d_in_p, d_out_p, batch_tile, vmem_cap)
        grid_k = h_p // h_tile
        chunk_w = (d_in_p * h_tile + h_tile * d_out_p) * 2 \
            + (h_tile + d_out_p) * 4
        htiled_fp = (2 * (bytes_x_tile + bytes_o_tile) + 2 * chunk_w
                     + batch_tile * d_out_p * 4 + batch_tile * h_tile * 4)
        if htiled_fp > int(0.85 * vmem_cap):
            # TODO(synk): also tile D_in / D_out for extremely wide layers.
            raise ValueError("MLP layer too wide for the H-tiled path on this "
                             "chip; D_in/D_out tiling not implemented yet.")
        vmem_limit = int(min(max(2 * htiled_fp + (4 << 20), 32 << 20),
                             int(0.9 * vmem_cap)))
        out = pl.pallas_call(
            _mlp_htiled_kernel,
            out_shape=jax.ShapeDtypeStruct((B_p, d_out_p), out_dtype),
            grid_spec=pltpu.PrefetchScalarGridSpec(
                num_scalar_prefetch=0,
                grid=(grid_b, grid_k),
                in_specs=[
                    pl.BlockSpec((batch_tile, d_in_p), lambda i, k: (i, 0)),
                    pl.BlockSpec((d_in_p, h_tile), lambda i, k: (0, k)),
                    pl.BlockSpec((1, h_tile), lambda i, k: (0, k)),
                    pl.BlockSpec((h_tile, d_out_p), lambda i, k: (k, 0)),
                    pl.BlockSpec((1, d_out_p), lambda i, k: (0, 0)),
                ],
                out_specs=pl.BlockSpec((batch_tile, d_out_p),
                                       lambda i, k: (i, 0)),
                scratch_shapes=[pltpu.VMEM((batch_tile, d_out_p), jnp.float32)],
            ),
            compiler_params=pltpu.CompilerParams(
                dimension_semantics=("parallel", "arbitrary"),
                vmem_limit_bytes=vmem_limit,
            ),
            cost_estimate=cost,
        )(x_p, w1_p, b1_p, w2_p, b2_p)

    return out[:B, :d_out]


def mlp_forward(x, w1, b1, w2, b2, *, batch_tile=None, force_h_tiled=False):
    """One-off convenience wrapper (re-pads params each call; prefer
    prepare_mlp_params + mlp_forward_padded for repeated inference)."""
    w1_p, b1_p, w2_p, b2_p = prepare_mlp_params(w1, b1, w2, b2)
    return mlp_forward_padded(x, w1_p, b1_p, w2_p, b2_p, d_out=w2.shape[1],
                              batch_tile=batch_tile,
                              force_h_tiled=force_h_tiled)


def xavier_uniform(key, fan_in, fan_out, dtype=jnp.float32):
    """Matches torch.nn.init.xavier_uniform_ for a (fan_in, fan_out) matrix."""
    bound = math.sqrt(6.0 / (fan_in + fan_out))
    return jax.random.uniform(
        key, (fan_in, fan_out), dtype=dtype, minval=-bound, maxval=bound
    )


if __name__ == "__main__":
    # Small shapes consistent with the module (equation "ab,bc->ac").
    batch = 24
    in_features = 48      # pads to 128 lanes
    hidden_size = 300     # pads to 384 -> H-tiled path runs 3 chunks of 128
    out_size = 20         # pads to 128 lanes

    key = jax.random.PRNGKey(0)
    kx, k1, k2 = jax.random.split(key, 3)

    x = jax.random.normal(kx, (batch, in_features), dtype=jnp.float32)

    # Deterministic parameter init mirroring the PyTorch __init__
    # (xavier-uniform weights, zero biases).
    W1 = xavier_uniform(k1, in_features, hidden_size)
    b1 = jnp.zeros((hidden_size,), dtype=jnp.float32)
    W2 = xavier_uniform(k2, hidden_size, out_size)
    b2 = jnp.zeros((out_size,), dtype=jnp.float32)

    # Pad + bf16-cast the parameters ONCE (per perf review), then reuse.
    params = prepare_mlp_params(W1, b1, W2, b2)

    # Path 1: fused kernel (weights VMEM-resident), auto batch tile with
    # >= 2 grid steps so the batch axis is megacore-splittable.
    out = mlp_forward_padded(x, *params, d_out=out_size)
    out = jax.block_until_ready(out)
    assert out.shape == (batch, out_size)

    # Path 2: H-streaming kernel (the v7x / large-hidden path), forced here so
    # the demo also exercises the pl.when-accumulator reduction grid.
    out_h = mlp_forward_padded(x, *params, d_out=out_size, force_h_tiled=True)
    out_h = jax.block_until_ready(out_h)
    assert out_h.shape == (batch, out_size)

    # Reference 1: same math & same bf16 operand quantization as the kernels.
    h_ref = jnp.tanh(
        jnp.dot(x.astype(jnp.bfloat16), W1.astype(jnp.bfloat16),
                preferred_element_type=jnp.float32) + b1)
    ref_bf16 = jnp.tanh(
        jnp.dot(h_ref.astype(jnp.bfloat16), W2.astype(jnp.bfloat16),
                preferred_element_type=jnp.float32) + b2)
    assert jnp.allclose(out, ref_bf16, atol=2e-3, rtol=2e-3)
    assert jnp.allclose(out_h, ref_bf16, atol=2e-3, rtol=2e-3)

    # Reference 2: full-f32 torch-equivalent forward (loose tolerance: the
    # kernels feed the MXU bf16 operands by design).
    ref_f32 = jnp.tanh(jnp.einsum("ab,bc->ac", x, W1) + b1)
    ref_f32 = jnp.tanh(jnp.einsum("ab,bc->ac", ref_f32, W2) + b2)
    assert jnp.allclose(out, ref_f32, atol=5e-2, rtol=5e-2)
    assert jnp.allclose(out_h, ref_f32, atol=5e-2, rtol=5e-2)

    print("KERNEL_OK")
</pallas_src>

<mosaic_0001>
module attributes {stable_mosaic.version = 11 : i64} {
  func.func @_mlp_fused_kernel(%arg0: i32, %arg1: memref<16x128xf32, #tpu.memory_space<vmem>>, %arg2: memref<128x384xbf16, #tpu.memory_space<vmem>>, %arg3: memref<1x384xf32, #tpu.memory_space<vmem>>, %arg4: memref<384x128xbf16, #tpu.memory_space<vmem>>, %arg5: memref<1x128xf32, #tpu.memory_space<vmem>>, %arg6: memref<16x128xf32, #tpu.memory_space<vmem>>) attributes {dimension_semantics = [#tpu.dimension_semantics<parallel>], iteration_bounds = array<i64: 2>, scalar_prefetch = 0 : i64, scratch_operands = 0 : i64, tpu.core_type = #tpu.core_type<tc>, window_params = [{transform_indices = @transform_0, window_bounds = array<i64: 16, 128>}, {pipeline_mode = #tpu.pipeline_mode<synchronous>, transform_indices = @transform_1, window_bounds = array<i64: 128, 384>}, {pipeline_mode = #tpu.pipeline_mode<synchronous>, transform_indices = @transform_2, window_bounds = array<i64: 1, 384>}, {pipeline_mode = #tpu.pipeline_mode<synchronous>, transform_indices = @transform_3, window_bounds = array<i64: 384, 128>}, {pipeline_mode = #tpu.pipeline_mode<synchronous>, transform_indices = @transform_4, window_bounds = array<i64: 1, 128>}, {transform_indices = @transform_5, window_bounds = array<i64: 16, 128>}]} {
    %c0 = arith.constant 0 : index
    %c0_0 = arith.constant 0 : index
    %0 = vector.load %arg1[%c0, %c0_0] : memref<16x128xf32, #tpu.memory_space<vmem>>, vector<16x128xf32>
    %1 = arith.truncf %0 : vector<16x128xf32> to vector<16x128xbf16>
    %c0_1 = arith.constant 0 : index
    %c0_2 = arith.constant 0 : index
    %2 = vector.load %arg2[%c0_1, %c0_2] : memref<128x384xbf16, #tpu.memory_space<vmem>>, vector<128x384xbf16>
    %cst = arith.constant dense<0.000000e+00> : vector<16x384xf32>
    %3 = tpu.matmul %1, %2, %cst {dimension_numbers = #tpu.dot_dimension_numbers<[1], [0], [0], [1], [0, 0, 1, 1], [], []>} : vector<16x128xbf16>, vector<128x384xbf16>, vector<16x384xf32> -> vector<16x384xf32>
    %c0_3 = arith.constant 0 : index
    %c0_4 = arith.constant 0 : index
    %4 = vector.load %arg3[%c0_3, %c0_4] : memref<1x384xf32, #tpu.memory_space<vmem>>, vector<1x384xf32>
    %5 = vector.broadcast %4 : vector<1x384xf32> to vector<16x384xf32>
    %6 = arith.addf %3, %5 : vector<16x384xf32>
    %7 = math.tanh %6 : vector<16x384xf32>
    %8 = arith.truncf %7 : vector<16x384xf32> to vector<16x384xbf16>
    %c0_5 = arith.constant 0 : index
    %c0_6 = arith.constant 0 : index
    %9 = vector.load %arg4[%c0_5, %c0_6] : memref<384x128xbf16, #tpu.memory_space<vmem>>, vector<384x128xbf16>
    %cst_7 = arith.constant dense<0.000000e+00> : vector<16x128xf32>
    %10 = tpu.matmul %8, %9, %cst_7 {dimension_numbers = #tpu.dot_dimension_numbers<[1], [0], [0], [1], [0, 0, 1, 1], [], []>} : vector<16x384xbf16>, vector<384x128xbf16>, vector<16x128xf32> -> vector<16x128xf32>
    %c0_8 = arith.constant 0 : index
    %c0_9 = arith.constant 0 : index
    %11 = vector.load %arg5[%c0_8, %c0_9] : memref<1x128xf32, #tpu.memory_space<vmem>>, vector<1x128xf32>
    %12 = vector.broadcast %11 : vector<1x128xf32> to vector<16x128xf32>
    %13 = arith.addf %10, %12 : vector<16x128xf32>
    %14 = math.tanh %13 : vector<16x128xf32>
    %c0_10 = arith.constant 0 : index
    %c0_11 = arith.constant 0 : index
    %15 = vector.load %arg6[%c0_10, %c0_11] : memref<16x128xf32, #tpu.memory_space<vmem>>, vector<16x128xf32>
    tpu.vector_store %arg6[%c0_10, %c0_11], %14 {strides = array<i32>} : memref<16x128xf32, #tpu.memory_space<vmem>>, vector<16x128xf32>,
    return
  }
  func.func @transform_0(%arg0: i32) -> (i32, i32) {
    %c0_i32 = arith.constant 0 : i32
    %c0_i32_0 = arith.constant 0 : i32
    return %arg0, %c0_i32 : i32, i32
  }
  func.func @transform_1(%arg0: i32) -> (i32, i32) {
    %c0_i32 = arith.constant 0 : i32
    %c0_i32_0 = arith.constant 0 : i32
    %c0_i32_1 = arith.constant 0 : i32
    return %c0_i32, %c0_i32_0 : i32, i32
  }
  func.func @transform_2(%arg0: i32) -> (i32, i32) {
    %c0_i32 = arith.constant 0 : i32
    %c0_i32_0 = arith.constant 0 : i32
    %c0_i32_1 = arith.constant 0 : i32
    return %c0_i32, %c0_i32_0 : i32, i32
  }
  func.func @transform_3(%arg0: i32) -> (i32, i32) {
    %c0_i32 = arith.constant 0 : i32
    %c0_i32_0 = arith.constant 0 : i32
    %c0_i32_1 = arith.constant 0 : i32
    return %c0_i32, %c0_i32_0 : i32, i32
  }
  func.func @transform_4(%arg0: i32) -> (i32, i32) {
    %c0_i32 = arith.constant 0 : i32
    %c0_i32_0 = arith.constant 0 : i32
    %c0_i32_1 = arith.constant 0 : i32
    return %c0_i32, %c0_i32_0 : i32, i32
  }
  func.func @transform_5(%arg0: i32) -> (i32, i32) {
    %c0_i32 = arith.constant 0 : i32
    %c0_i32_0 = arith.constant 0 : i32
    return %arg0, %c0_i32 : i32, i32
  }
}

</mosaic_0001>

<bundles_post_ra>
// kernel: mlp_forward_padded.1
= control target key start
LH: loop header
LB: loop body
LE: loop exit
PB: predicated region body
PF: predicated region fallthrough
CT: control target
= control target key end

     0   :  { %10 = vsyncpa [#allocation3], 0  ;;  %s1352_s0 = inlined_call_operand.vmem [shape: f32[32,128], index: 0, kind: input, shape index: {}]   ;;  %s1353_s1 = inlined_call_operand.hbm [shape: bf16[128,384], index: 1, kind: input, shape index: {}]   ;;  %s1354_s2 = inlined_call_operand.vmem [shape: f32[1,384], index: 2, kind: input, shape index: {}]   ;;  %s1355_s3 = inlined_call_operand.hbm [shape: bf16[384,128], index: 3, kind: input, shape index: {}]   ;;  %s1356_s4 = inlined_call_operand.vmem [shape: f32[1,128], index: 4, kind: input, shape index: {}]   ;;  %s1357_s5 = inlined_call_operand.vmem [shape: f32[32,128], index: 5, kind: output, shape index: {}]  }
   0x1   :  { %11 = vsyncpa [#allocation5], 0  ;;  %s1254_s18 = smov 0  }
   0x2 LB: > { %s1215_s19 = smov [#allocation2]   ;;  %s895_s21 = sadd.s32 4294967295, %s1213_s18   ;;  %s1213_s18 = sphi %s1254_s18, %s17_s18  }
   0x3   : > { %s170_s20 = sshll.u32 %s1215_s19, 4  ;;  %p897_p0 = scmp.ge.s32.totalorder %s1213_s18, 1  ;;  %s171_s20 = int_to_ptr.vmem [resolvable:$true] %s170_s20 }
   0x4   : > { %p158_p1 = scmp.lt.s32.totalorder %s1213_s18, 3  ;;  %p1268_p3 = scmp.eq.s32.totalorder %s895_s21, 0 }
   0x5   : > { %s1216_s24 = smov [#allocation4]   ;;  %s1158_s27 = scalar_lea.vmem %s171_s20, 3072 }
   0x6   : > { %p1262_p2 = pnand %p897_p0, %p158_p1  ;;  %s186_s25 = sshll.u32 %s1216_s24, 4  ;;  %s187_s25 = int_to_ptr.vmem [resolvable:$true] %s186_s25 }
   0x7   : > { %p1159_p7 = scmp.ne.s32.totalorder %s171_s20, %s1158_s27  ;;  %p1166_p10 = scmp.lt.s32.totalorder %s171_s20, %s171_s20 }
   0x8   : > { %p1047_p4 = pneg %p1262_p2  ;;  %p1167_p11 = scmp.lt.s32.totalorder %s1158_s27, %s1158_s27 }
   0xa   : > { %p1276_p5 = pnand %p1268_p3, %p1047_p4  ;;  %p1168_p12 = por %p1167_p11, %p1166_p10 }
   0xc   : > { %p1149_p6 = pneg %p1276_p5 }
   0xe   : > { %p1161_p8 = pnand %p1159_p7, %p1149_p6 }
  0x10   : > { %p1162_p9 = pneg %p1161_p8 }
  0x12   : > { %p1169_p13 = pnand %p1168_p12, %p1162_p9 }
  0x14   : > { %1172 = shalt.err (!%p1169_p13)
}
  0x15   : > { %s1217_s28 = smov 192   ;;  %s1218_s29 = smov 12  }
  0x16   : > { %1050 = dma.hbm_to_vmem [thread:$0]  (!%p1276_p5), %s1353_s1, 3072, %s171_s20, [#allocation3], %s1217_s28, %s1217_s28, %s1218_s29  }
  0x17   : > { %s1184_s7 = scalar_lea.vmem %s187_s25, 3072  ;;  %p1192_p7 = scmp.lt.s32.totalorder %s187_s25, %s187_s25 }
  0x18   : > { %p1185_p0 = scmp.ne.s32.totalorder %s187_s25, %s1184_s7  ;;  %p1193_p8 = scmp.lt.s32.totalorder %s1184_s7, %s1184_s7 }
  0x1a   : > { %p1187_p1 = pnand %p1185_p0, %p1149_p6  ;;  %p1194_p10 = por %p1193_p8, %p1192_p7 }
  0x1c   : > { %p1188_p4 = pneg %p1187_p1 }
  0x1e   : > { %p1195_p9 = pnand %p1194_p10, %p1188_p4 }
  0x20   : > { %1198 = shalt.err (!%p1195_p9)
}
  0x21   : > { %s1219_s8 = smov 64   ;;  %s1220_s9 = smov 4  }
  0x22   : > { %1053 = dma.hbm_to_vmem [thread:$0]  (!%p1276_p5), %s1355_s3, 3072, %s187_s25, [#allocation5], %s1219_s8, %s1219_s8, %s1220_s9  }
  0x23   : > { %214 = sbr.rel (%p1262_p2) target bundleno = 516 (0x204), region = 40 }
  0x28   : > { %1204 = dma.done.wait (%p1268_p3), [#allocation3], 3072  }
  0x29   : > { %1206 = vsyncadd (%p1268_p3), [#allocation3], 4294964224 }
  0x2a   : > { %1208 = dma.done.wait (%p1268_p3), [#allocation5], 3072  }
  0x2b   : > { %1210 = vsyncadd (%p1268_p3), [#allocation5], 4294964224  ;;  %v1221_v0 = vmov 0.0   ;;  %vm1222_vm0 = vmmov 0   ;;  %v1223_v1 = vmov 0   ;;  %s904_s12 = sshll.u32 %s895_s21, 1  ;;  %v296_v53 = vlaneseq }
  0x2c   : > { %999 = vmatprep.subr.bf16.mxu1 %v1221_v0  ;;  %1015 = vmatprep.mubr.msk.bf16.mxu1 %vm1222_vm0, %v1221_v0  ;;  %v1075_v2 = vld [vmem:[#allocation2 + $0xac] ss:$12 sps:$4 sm:$0xff]   ;;  %v1077_v3 = vld [vmem:[#allocation2 + $0xb0] ss:$12 sps:$4 sm:$0xff]   ;;  %v1078_v4 = vld [vmem:[#allocation2 + $0xa8] ss:$12 sps:$4 sm:$0xff]  }
  0x2d   : > { %471 = vmatprep.mubr.bf16.mxu0 %v1223_v1  ;;  %439 = vmatprep.subr.bf16.mxu0 %v1075_v2  ;;  %v1079_v5 = vld [vmem:[#allocation2 + $0x94] ss:$12 sps:$4 sm:$0xff]   ;;  %v1081_v6 = vld [vmem:[#allocation2 + $0x98] ss:$12 sps:$4 sm:$0xff]   ;;  %v1082_v7 = vld [vmem:[#allocation2 + $0x90] ss:$12 sps:$4 sm:$0xff]  }
  0x2e   : > { %1000 = vmatpush3.bf16.msra.mxu1 %v1077_v3  ;;  %440 = vmatpush1.bf16.msra.mxu0 %v1078_v4  ;;  %v1083_v8 = vld [vmem:[#allocation2 + $0x7c] ss:$12 sps:$4 sm:$0xff]   ;;  %v1085_v9 = vld [vmem:[#allocation2 + $0x80] ss:$12 sps:$4 sm:$0xff]   ;;  %v1086_v10 = vld [vmem:[#allocation2 + $0x78] ss:$12 sps:$4 sm:$0xff]  }
  0x2f   : > { %1001 = vmatprep.subr.bf16.mxu1 %v1221_v0  ;;  %441 = vmatprep.subr.bf16.mxu0 %v1079_v5  ;;  %v1087_v11 = vld [vmem:[#allocation2 + $0x64] ss:$12 sps:$4 sm:$0xff]   ;;  %p247_p2 = scmp.lt.s32.totalorder %s904_s12, 3  ;;  %v1089_v12 = vld [vmem:[#allocation2 + $0x68] ss:$12 sps:$4 sm:$0xff]   ;;  %v1108_v28 = vld [vmem:[#allocation4 + $0x78] sm:$0xff]  }
  0x30   : > { %v1090_v13 = vld [vmem:[#allocation2 + $0x60] ss:$12 sps:$4 sm:$0xff]   ;;  %v1093_v15 = vld [vmem:[#allocation2 + $0x50] ss:$12 sps:$4 sm:$0xff]   ;;  %v1094_v16 = vld [vmem:[#allocation2 + $0x48] ss:$12 sps:$4 sm:$0xff]  }
  0x31   : > { %v1091_v14 = vld [vmem:[#allocation2 + $0x4c] ss:$12 sps:$4 sm:$0xff]   ;;  %s1362_s12 = smov (!%p247_p2, %s904_s12), 3  ;;  %v1095_v17 = vld [vmem:[#allocation2 + $0x34] ss:$12 sps:$4 sm:$0xff]   ;;  %v297_v54 = vshrl.u32 %v296_v53, 7 }
  0x32   : > { %1002 = vmatpush3.bf16.msra.mxu1 %v1081_v6  ;;  %442 = vmatpush1.bf16.msra.mxu0 %v1082_v7  ;;  %s905_s13 = sshll.u32 %s1362_s12, 3  ;;  %v1097_v18 = vld [vmem:[#allocation2 + $0x38] ss:$12 sps:$4 sm:$0xff]   ;;  %v1098_v19 = vld [vmem:[#allocation2 + $0x30] ss:$12 sps:$4 sm:$0xff]   ;;  %v1113_v35 = vld [vmem:[#allocation4 + $0xa8] sm:$0xff]  }
  0x33   : > { %1003 = vmatprep.subr.bf16.mxu1 %v1221_v0  ;;  %443 = vmatprep.subr.bf16.mxu0 %v1083_v8  ;;  %v1099_v20 = vld [vmem:[#allocation2 + $0x1c] ss:$12 sps:$4 sm:$0xff]   ;;  %s250_s16 = scalar_lea.vmem %s1352_s0, %s905_s13  ;;  %v1101_v21 = vld [vmem:[#allocation2 + $0x20] ss:$12 sps:$4 sm:$0xff]   ;;  %v1102_v22 = vld [vmem:[#allocation2 + $0x18] ss:$12 sps:$4 sm:$0xff]   ;;  %s256_s24 = scalar_lea.vmem %s1357_s5, %s905_s13 }
  0x34   : > { %v1103_v23 = vld [vmem:[#allocation2 + $0x4] ss:$12 sps:$4 sm:$0xff]   ;;  %v1105_v24 = vld [vmem:[#allocation2 + $0x8] ss:$12 sps:$4 sm:$0xff]   ;;  %v1106_v27 = vld [vmem:[#allocation2] ss:$12 sps:$4 sm:$0xff]  }
  0x35   : > { %v259_v25 = vld [vmem:[%s250_s16] sm:$0xff]  ;;  %v260_v26 = vld [vmem:[%s250_s16 + $0x8] sm:$0xff]  ;;  %v1107_v29 = vld [vmem:[#allocation4 + $0xb8] sm:$0xff]   ;;  %v306_v55 = vsub.s32 2, %v297_v54  ;;  %v302_v57 = vsub.s32 1, %v297_v54  ;;  %v298_v59 = vsub.s32 0, %v297_v54 }
  0x36   : > { %1004 = vmatpush3.bf16.msra.mxu1 %v1085_v9  ;;  %444 = vmatpush1.bf16.msra.mxu0 %v1086_v10  ;;  %v261_v30 = vpack.c.bf16 %v260_v26, %v259_v25  ;;  %v1109_v31 = vld [vmem:[#allocation4 + $0x38] sm:$0xff]   ;;  %v1111_v32 = vld [vmem:[#allocation4 + $0x70] sm:$0xff]   ;;  %v1114_v36 = vld [vmem:[#allocation4 + $0x68] sm:$0xff]  }
  0x37   : > { %1005 = vmatprep.subr.bf16.mxu1 %v1221_v0  ;;  %445 = vmatprep.subr.bf16.mxu0 %v1087_v11  ;;  %v1110_v33 = vld [vmem:[#allocation4 + $0xb0] sm:$0xff]   ;;  %v1115_v37 = vld [vmem:[#allocation4 + $0x28] sm:$0xff]   ;;  %v1116_v38 = vld [vmem:[#allocation4 + $0xa0] sm:$0xff]  }
  0x38   : > { %v1112_v34 = vld [vmem:[#allocation4 + $0x30] sm:$0xff]   ;;  %v1117_v39 = vld [vmem:[#allocation4 + $0x60] sm:$0xff]   ;;  %v1119_v41 = vld [vmem:[#allocation4 + $0x98] sm:$0xff]  }
  0x39   : > { %v1118_v40 = vld [vmem:[#allocation4 + $0x20] sm:$0xff]   ;;  %v1120_v42 = vld [vmem:[#allocation4 + $0x58] sm:$0xff]   ;;  %v1122_v44 = vld [vmem:[#allocation4 + $0x90] sm:$0xff]  }
  0x3a   : > { %1006 = vmatpush3.bf16.msra.mxu1 %v1089_v12  ;;  %446 = vmatpush1.bf16.msra.mxu0 %v1090_v13  ;;  %v1121_v43 = vld [vmem:[#allocation4 + $0x18] sm:$0xff]   ;;  %v1123_v45 = vld [vmem:[#allocation4 + $0x50] sm:$0xff]   ;;  %v1125_v47 = vld [vmem:[#allocation4 + $0x88] sm:$0xff]  }
  0x3b   : > { %1007 = vmatprep.subr.bf16.mxu1 %v1221_v0  ;;  %447 = vmatprep.subr.bf16.mxu0 %v1091_v14  ;;  %v1124_v46 = vld [vmem:[#allocation4 + $0x10] sm:$0xff]   ;;  %v1126_v48 = vld [vmem:[#allocation4 + $0x48] sm:$0xff]   ;;  %v1128_v50 = vld [vmem:[#allocation4 + $0x80] sm:$0xff]  }
  0x3c   : > { %v1127_v49 = vld [vmem:[#allocation4 + $0x8] sm:$0xff]   ;;  %v1129_v51 = vld [vmem:[#allocation4 + $0x40] sm:$0xff]  }
  0x3d   : > { %v1130_v52 = vld [vmem:[#allocation4] sm:$0xff]  }
  0x3e   : > { %1008 = vmatpush3.bf16.msra.mxu1 %v1093_v15  ;;  %448 = vmatpush1.bf16.msra.mxu0 %v1094_v16  ;;  %v294_v56 = vld [vmem:[%s1354_s2] sm:$0x7] }
  0x3f   : > { %1009 = vmatprep.subr.bf16.mxu1 %v1221_v0  ;;  %449 = vmatprep.subr.bf16.mxu0 %v1095_v17  ;;  %v307_v58 = vrot.slane %v294_v56, %v306_v55  ;;  %v303_v61 = vrot.slane %v294_v56, %v302_v57  ;;  %v299_v1 = vrot.slane %v294_v56, %v298_v59  ;;  %v932_v25 = vld [vmem:[%s1356_s4] ss:$0 sm:$0xff] }
  0x42   : > { %1010 = vmatpush3.bf16.msra.mxu1 %v1097_v18  ;;  %450 = vmatpush1.bf16.msra.mxu0 %v1098_v19 }
  0x43   : > { %1011 = vmatprep.subr.bf16.mxu1 %v1221_v0  ;;  %451 = vmatprep.subr.bf16.mxu0 %v1099_v20 }
  0x46   : > { %1012 = vmatpush3.bf16.msra.mxu1 %v1101_v21  ;;  %452 = vmatpush1.bf16.msra.mxu0 %v1102_v22 }
  0x47   : > { %1013 = vmatprep.subr.bf16.mxu1 %v1221_v0  ;;  %453 = vmatprep.subr.bf16.mxu0 %v1103_v23 }
  0x4a   : > { %1014 = vmatpush3.bf16.msra.mxu1 %v1105_v24  ;;  %454 = vmatpush1.bf16.msra.mxu0 %v1106_v27 }
  0x4b   : > { %1019 = vmatprep.subr.bf16.mxu1 %v1221_v0  ;;  %968 = vmatprep.subr.bf16.mxu0 %v1108_v28 }
  0x4d   : > { %1016 = vmatmul.mubr.bf16.vlgmr.msra.gmra.mxu1 %v261_v30  ;;  %472 = vmatmul.mubr.bf16.vlgmr.msra.gmra.mxu0 %v261_v30 }
  0x4e   : > { %1020 = vmatpush3.bf16.msra.mxu1 %v1107_v29  ;;  %969 = vmatpush3.bf16.msra.mxu0 %v1109_v31 }
  0x4f   : > { %1021 = vmatprep.subr.bf16.mxu1 %v1221_v0  ;;  %970 = vmatprep.subr.bf16.mxu0 %v1111_v32 }
  0x50   : > { %1035 = vmatprep.mubr.msk.bf16.mxu1 %vm1222_vm0, %v1221_v0 }
  0x52   : > { %1022 = vmatpush3.bf16.msra.mxu1 %v1110_v33  ;;  %971 = vmatpush3.bf16.msra.mxu0 %v1112_v34 }
  0x53   : > { %1023 = vmatprep.subr.bf16.mxu1 %v1221_v0  ;;  %972 = vmatprep.subr.bf16.mxu0 %v1114_v36 }
  0x56   : > { %1024 = vmatpush3.bf16.msra.mxu1 %v1113_v35  ;;  %973 = vmatpush3.bf16.msra.mxu0 %v1115_v37 }
  0x57   : > { %1025 = vmatprep.subr.bf16.mxu1 %v1221_v0  ;;  %974 = vmatprep.subr.bf16.mxu0 %v1117_v39 }
  0x5a   : > { %1026 = vmatpush3.bf16.msra.mxu1 %v1116_v38  ;;  %975 = vmatpush3.bf16.msra.mxu0 %v1118_v40 }
  0x5b   : > { %1027 = vmatprep.subr.bf16.mxu1 %v1221_v0  ;;  %976 = vmatprep.subr.bf16.mxu0 %v1120_v42 }
  0x5e   : > { %1028 = vmatpush3.bf16.msra.mxu1 %v1119_v41  ;;  %977 = vmatpush3.bf16.msra.mxu0 %v1121_v43 }
  0x5f   : > { %1029 = vmatprep.subr.bf16.mxu1 %v1221_v0  ;;  %978 = vmatprep.subr.bf16.mxu0 %v1123_v45 }
  0x62   : > { %1030 = vmatpush3.bf16.msra.mxu1 %v1122_v44  ;;  %979 = vmatpush3.bf16.msra.mxu0 %v1124_v46 }
  0x63   : > { %1031 = vmatprep.subr.bf16.mxu1 %v1221_v0  ;;  %980 = vmatprep.subr.bf16.mxu0 %v1126_v48 }
  0x66   : > { %1032 = vmatpush3.bf16.msra.mxu1 %v1125_v47  ;;  %981 = vmatpush3.bf16.msra.mxu0 %v1127_v49 }
  0x67   : > { %1033 = vmatprep.subr.bf16.mxu1 %v1221_v0  ;;  %982 = vmatprep.subr.bf16.mxu0 %v1129_v51 }
  0x6a   : > { %1034 = vmatpush3.bf16.msra.mxu1 %v1128_v50  ;;  %983 = vmatpush3.bf16.msra.mxu0 %v1130_v52 }
 0x10d   : > { %v516_v60 = vpop.f32.mrf.mxu1  ;;  %v473_v63 = vpop.f32.mrf.mxu0 }
 0x10e   : > { %v517_v62 = vadd.f32 %v516_v60, %v307_v58  ;;  %v474_v9 = vadd.f32 %v473_v63, %v299_v1 }
 0x10f   : > { %v1017_v0 = vpop.f32.mrf.mxu1  ;;  %v475_v2 = vpop.f32.mrf.mxu0 }
 0x110   : > { %v476_v3 = vadd.f32 %v475_v2, %v303_v61  ;;  %1131 = vtanh.f32 %v517_v62 }
 0x111   : > { %v519_v4 = vpop.f32.mrf.mxu1  ;;  %v477_v6 = vpop.f32.mrf.mxu0 }
 0x112   : > { %v520_v5 = vadd.f32 %v519_v4, %v307_v58  ;;  %v478_v7 = vadd.f32 %v477_v6, %v299_v1 }
 0x113   : > { %v1018_v8 = vpop.f32.mrf.mxu1  ;;  %v479_v10 = vpop.f32.mrf.mxu0 }
 0x114   : > { %1133 = vtanh.f32 %v520_v5  ;;  %v480_v11 = vadd.f32 %v479_v10, %v303_v61 }
 0x115   : > { %1135 = vtanh.f32 %v476_v3 }
 0x116   : > { %1137 = vtanh.f32 %v478_v7 }
 0x117   : > { %1139 = vtanh.f32 %v480_v11 }
 0x118   : > { %1141 = vtanh.f32 %v474_v9 }
 0x11d   : > { %v1132_v12 = vpop.eup %1131 }
 0x121   : > { %v1134_v13 = vpop.eup %1133 }
 0x122   : > { %v1136_v14 = vpop.eup %1135  ;;  %v531_v15 = vpack.c.bf16 %v1134_v13, %v1132_v12 }
 0x123   : > { %v1138_v16 = vpop.eup %1137 }
 0x124   : > { %v1140_v17 = vpop.eup %1139  ;;  %1036 = vmatmul.mubr.bf16.vlgmr.msra.gmra.mxu1 %v531_v15 }
 0x125   : > { %v1142_v18 = vpop.eup %1141  ;;  %v530_v19 = vpack.c.bf16 %v1140_v17, %v1136_v14 }
 0x126   : > { %v529_v20 = vpack.c.bf16 %v1138_v16, %v1142_v18 }
 0x127   : > { %763 = vmatprep.mubr.bf16.mxu0 %v530_v19 }
 0x128   : > { %764 = vmatmul.mubr.bf16.vlgmr.msra.gmra.mxu0 %v529_v20 }
 0x1e4   : > { %v806_v21 = vpop.f32.mrf.mxu1 }
 0x1e6   : > { %v1037_v22 = vpop.f32.mrf.mxu1 }
 0x1e8   : > { %v984_v23 = vpop.f32.mrf.mxu0  ;;  %v809_v24 = vpop.f32.mrf.mxu1 }
 0x1ea   : > { %v985_v26 = vpop.f32.mrf.mxu0  ;;  %v1038_v27 = vpop.f32.mrf.mxu1 }
 0x1eb   : > { %v986_v28 = vadd.f32 %v985_v26, %v984_v23 }
 0x1ec   : > { %v987_v29 = vpop.f32.mrf.mxu0 }
 0x1ed   : > { %v766_v30 = vadd.f32 %v986_v28, %v932_v25 }
 0x1ee   : > { %v988_v31 = vpop.f32.mrf.mxu0 }
 0x1ef   : > { %v807_v32 = vadd.f32 %v806_v21, %v766_v30  ;;  %v989_v33 = vadd.f32 %v988_v31, %v987_v29 }
 0x1f1   : > { %1143 = vtanh.f32 %v807_v32  ;;  %v769_v34 = vadd.f32 %v989_v33, %v932_v25 }
 0x1f3   : > { %v810_v35 = vadd.f32 %v809_v24, %v769_v34 }
 0x1f5   : > { %1145 = vtanh.f32 %v810_v35 }
 0x1fe   : > { %v1144_v36 = vpop.eup %1143 }
 0x1ff   : > { %815 = vst [vmem:[%s256_s24] sm:$0xff] %v1144_v36 }
 0x202   : > { %v1146_v37 = vpop.eup %1145 }
 0x203   : > { %816 = vst [vmem:[%s256_s24 + $0x8] sm:$0xff] %v1146_v37 }
 0x204 PF: > { %s17_s18 = sadd.s32 1, %s1213_s18  }
 0x205   : > { %p14_p3 = scmp.ge.s32.totalorder %s17_s18, 4  }
 0x207   :  { %16 = sbr.rel (!%p14_p3) target bundleno = 2 (0x2), region = 79 }
 0x20c   :  { %839 = vsyncpa [#allocation3], 1 }
 0x20d   :  { %841 = vsyncpa [#allocation3 + $0x1], 1 }
 0x20e   :  { %842 = vsyncpa [#allocation5], 1 }

</bundles_post_ra>
